<compile_context>
chip_gen: v6e
topology: v6e:2x2x1
jax: 0.10.0
libtpu: 0.0.40
codegen_flags: <defaults>
</compile_context>

<pallas_src>
import functools

import jax
import jax.numpy as jnp
from jax.experimental import pallas as pl
from jax.experimental.pallas import tpu as pltpu


# ---------------------------------------------------------------------------
# Kernel
# ---------------------------------------------------------------------------
def _contrastive_kernel(o1_ref, o2_ref, lbl_ref, out_ref, acc_ref, *,
                        margin, eps, block_d, D):
    """Grid = (batch tiles [parallel], feature tiles [arbitrary])."""
    k = pl.program_id(1)
    nk = pl.num_programs(1)

    @pl.when(k == 0)
    def _():
        acc_ref[...] = jnp.zeros_like(acc_ref)

    # PyTorch's pairwise_distance adds eps to the *difference* element-wise.
    diff = o1_ref[...].astype(jnp.float32) - o2_ref[...].astype(jnp.float32) + eps
    if D % block_d != 0:
        # Ragged last feature block: zero the out-of-range columns so stale VMEM
        # garbage cannot pollute the reduction.
        col = jax.lax.broadcasted_iota(jnp.int32, diff.shape, 1) + k * block_d
        diff = jnp.where(col < D, diff, 0.0)
    acc_ref[...] += jnp.sum(diff * diff, axis=-1, keepdims=True)   # (block_b, 1)

    @pl.when(k == nk - 1)
    def _():
        d2 = acc_ref[...]
        d = jnp.sqrt(d2)
        lbl = lbl_ref[...]                                           # (block_b, 1) f32
        hinge = jnp.maximum(margin - d, 0.0)
        # "Similar" term uses d^2 directly (no sqrt->square round trip).
        out_ref[...] = lbl * d2 + (1.0 - lbl) * (hinge * hinge)


# ---------------------------------------------------------------------------
# Tiling / VMEM sizing helpers
# ---------------------------------------------------------------------------
def _sublane_multiple(dtype):
    # 8 rows for 4-byte, 16 for 2-byte, 32 for 1-byte dtypes.
    return max(8, 32 // jnp.dtype(dtype).itemsize)


def _vmem_capacity_bytes():
    try:
        return int(pltpu.get_tpu_info().vmem_capacity_bytes)
    except Exception:
        return 64 << 20  # conservative default (v7x per-TensorCore VMEM)


def _round_up(x, m):
    return -(-x // m) * m


def _round_down(x, m):
    return max(m, (x // m) * m)


# Bytes of lane-padded (block_b, 1) f32 blocks per batch row:
# 2 label buffers + 2 output buffers + 1 accumulator scratch, each padded to 128 lanes.
_LANE_PAD_PER_ROW = 5 * 128 * 4


def _choose_tiling(B, D, dtype, *, target_step_bytes=8 << 20):
    """Pick (block_b, block_d) from dtype, D and the chip's VMEM capacity."""
    itemsize = jnp.dtype(dtype).itemsize
    sub = _sublane_multiple(dtype)
    cap = _vmem_capacity_bytes()
    # Budget for double-buffered tiles (2 inputs x 2 pipeline buffers + (.,1) blocks).
    tile_budget = min(int(cap * 0.55), 64 << 20)

    # Feature tiling: only when a minimal-batch tile already exceeds the budget.
    block_d = D
    if 4 * sub * D * itemsize > tile_budget:
        block_d = _round_down(tile_budget // (4 * sub * itemsize), 128)

    # Batch tiling: target multi-MiB per-step DMA, bounded by the VMEM budget.
    row_read_bytes = 2 * block_d * itemsize                  # both inputs, one buffer
    row_vmem_bytes = 4 * block_d * itemsize + _LANE_PAD_PER_ROW
    bb_target = _round_down(target_step_bytes // max(row_read_bytes, 1), sub)
    bb_vmem = _round_down(tile_budget // row_vmem_bytes, sub)
    block_b = min(bb_target, bb_vmem)

    if B <= sub:
        block_b = B                                          # full-dim block is legal
    else:
        B_ceil = _round_up(B, sub)
        block_b = min(block_b, B_ceil)
        # Keep >= 2 batch blocks so both TensorCores get work on v7x megacore.
        if B_ceil >= 2 * sub:
            block_b = min(block_b, _round_up(B_ceil // 2, sub))

    return block_b, block_d


# ---------------------------------------------------------------------------
# Wrapper
# ---------------------------------------------------------------------------
def contrastive_loss(output1, output2, label, *, margin=1.0, eps=1e-9,
                     block_b=None, block_d=None):
    """output1, output2: (B, D); label: (B,) {0,1}. Returns scalar float32 loss."""
    B, D = output1.shape
    itemsize = jnp.dtype(output1.dtype).itemsize

    auto_bb, auto_bd = _choose_tiling(B, D, output1.dtype)
    if block_b is None:
        block_b = auto_bb
    if block_d is None:
        block_d = auto_bd

    n_b = pl.cdiv(B, block_b)
    n_d = pl.cdiv(D, block_d)

    label2d = label.astype(jnp.float32).reshape(B, 1)

    # Accurate VMEM footprint: double-buffered inputs + lane-padded (.,1) blocks.
    cap = _vmem_capacity_bytes()
    in_flight = block_b * (4 * block_d * itemsize + _LANE_PAD_PER_ROW)
    vmem_limit = int(min(max(in_flight + (4 << 20), 16 << 20), int(cap * 0.8)))

    kernel = functools.partial(
        _contrastive_kernel,
        margin=float(margin), eps=float(eps), block_d=block_d, D=D,
    )

    per_row = pl.pallas_call(
        kernel,
        out_shape=jax.ShapeDtypeStruct((B, 1), jnp.float32),
        grid_spec=pltpu.PrefetchScalarGridSpec(
            num_scalar_prefetch=0,
            grid=(n_b, n_d),
            in_specs=[
                pl.BlockSpec((block_b, block_d), lambda i, k: (i, k)),
                pl.BlockSpec((block_b, block_d), lambda i, k: (i, k)),
                pl.BlockSpec((block_b, 1), lambda i, k: (i, 0)),
            ],
            out_specs=pl.BlockSpec((block_b, 1), lambda i, k: (i, 0)),
            scratch_shapes=[pltpu.VMEM((block_b, 1), jnp.float32)],
        ),
        compiler_params=pltpu.CompilerParams(
            dimension_semantics=("parallel", "arbitrary"),
            vmem_limit_bytes=vmem_limit,
        ),
    )(output1, output2, label2d)

    # TODO(synk): if profiles ever show store-slot stalls, emit a lane-dense
    # (n_b, block_b) loss slab instead of the (B, 1) single-lane output.

    # Final mean over the original batch rows (any ragged-tile garbage rows excluded).
    return jnp.mean(per_row[:B, 0])


def contrastive_loss_ref(output1, output2, label, *, margin=1.0, eps=1e-9):
    """Pure-JAX reference mirroring the PyTorch module."""
    diff = output1.astype(jnp.float32) - output2.astype(jnp.float32) + eps
    d = jnp.sqrt(jnp.sum(diff * diff, axis=-1))
    lbl = label.astype(jnp.float32)
    hinge = jnp.maximum(margin - d, 0.0)
    return jnp.mean(lbl * d**2 + (1.0 - lbl) * hinge**2)


if __name__ == "__main__":
    key = jax.random.PRNGKey(0)
    k1, k2, k3 = jax.random.split(key, 3)

    # Small shapes consistent with siamese embedding outputs.
    B, D = 16, 32
    output1 = jax.random.normal(k1, (B, D), dtype=jnp.float32)
    output2 = jax.random.normal(k2, (B, D), dtype=jnp.float32)
    label = jax.random.bernoulli(k3, p=0.5, shape=(B,)).astype(jnp.int32)

    loss = jax.block_until_ready(contrastive_loss(output1, output2, label, margin=1.0))
    ref = contrastive_loss_ref(output1, output2, label, margin=1.0)
    assert jnp.allclose(loss, ref, rtol=1e-5, atol=1e-6), (loss, ref)

    # Ragged batch path (batch not a multiple of the tile; no wrapper-side padding).
    B2 = 10
    loss2 = jax.block_until_ready(
        contrastive_loss(output1[:B2], output2[:B2], label[:B2], margin=1.0)
    )
    ref2 = contrastive_loss_ref(output1[:B2], output2[:B2], label[:B2], margin=1.0)
    assert jnp.allclose(loss2, ref2, rtol=1e-5, atol=1e-6), (loss2, ref2)

    # Forced D-tiling path (block_d < D, multiple of 128) exercising the accumulator.
    B3, D3 = 16, 384
    o1 = jax.random.normal(k1, (B3, D3), dtype=jnp.float32)
    o2 = jax.random.normal(k2, (B3, D3), dtype=jnp.float32)
    lb = jax.random.bernoulli(k3, p=0.5, shape=(B3,)).astype(jnp.int32)
    loss3 = jax.block_until_ready(
        contrastive_loss(o1, o2, lb, margin=1.0, block_b=8, block_d=128)
    )
    ref3 = contrastive_loss_ref(o1, o2, lb, margin=1.0)
    assert jnp.allclose(loss3, ref3, rtol=1e-5, atol=1e-6), (loss3, ref3)

    print("KERNEL_OK")
</pallas_src>

<mosaic_0001>
module attributes {stable_mosaic.version = 11 : i64} {
  func.func @_contrastive_kernel(%arg0: i32, %arg1: i32, %arg2: memref<8x32xf32, #tpu.memory_space<vmem>>, %arg3: memref<8x32xf32, #tpu.memory_space<vmem>>, %arg4: memref<8x1xf32, #tpu.memory_space<vmem>>, %arg5: memref<8x1xf32, #tpu.memory_space<vmem>>, %arg6: memref<8x1xf32, #tpu.memory_space<vmem>>) attributes {dimension_semantics = [#tpu.dimension_semantics<parallel>, #tpu.dimension_semantics<arbitrary>], iteration_bounds = array<i64: 2, 1>, scalar_prefetch = 0 : i64, scratch_operands = 1 : i64, tpu.core_type = #tpu.core_type<tc>, window_params = [{transform_indices = @transform_0, window_bounds = array<i64: 8, 32>}, {transform_indices = @transform_1, window_bounds = array<i64: 8, 32>}, {transform_indices = @transform_2, window_bounds = array<i64: 8, 1>}, {transform_indices = @transform_3, window_bounds = array<i64: 8, 1>}]} {
    %c0_i32 = arith.constant 0 : i32
    %0 = arith.cmpi eq, %arg1, %c0_i32 : i32
    %1 = arith.extui %0 : i1 to i32
    %c0_i32_0 = arith.constant 0 : i32
    %2 = arith.cmpi ne, %1, %c0_i32_0 : i32
    scf.if %2 {
      %cst_11 = arith.constant 0.000000e+00 : f32
      %17 = vector.broadcast %cst_11 : f32 to vector<8x1xf32>
      %c0_12 = arith.constant 0 : index
      %c0_13 = arith.constant 0 : index
      %18 = vector.load %arg6[%c0_12, %c0_13] : memref<8x1xf32, #tpu.memory_space<vmem>>, vector<8x1xf32>
      tpu.vector_store %arg6[%c0_12, %c0_13], %17 {strides = array<i32>} : memref<8x1xf32, #tpu.memory_space<vmem>>, vector<8x1xf32>,
    } else {
    }
    %c0 = arith.constant 0 : index
    %c0_1 = arith.constant 0 : index
    %3 = vector.load %arg2[%c0, %c0_1] : memref<8x32xf32, #tpu.memory_space<vmem>>, vector<8x32xf32>
    %c0_2 = arith.constant 0 : index
    %c0_3 = arith.constant 0 : index
    %4 = vector.load %arg3[%c0_2, %c0_3] : memref<8x32xf32, #tpu.memory_space<vmem>>, vector<8x32xf32>
    %5 = arith.subf %3, %4 : vector<8x32xf32>
    %cst = arith.constant 9.99999971E-10 : f32
    %6 = vector.broadcast %cst : f32 to vector<8x32xf32>
    %7 = arith.addf %5, %6 : vector<8x32xf32>
    %c0_4 = arith.constant 0 : index
    %c0_5 = arith.constant 0 : index
    %8 = vector.load %arg6[%c0_4, %c0_5] : memref<8x1xf32, #tpu.memory_space<vmem>>, vector<8x1xf32>
    %9 = arith.mulf %7, %7 : vector<8x32xf32>
    %cst_6 = arith.constant dense<0.000000e+00> : vector<8xf32>
    %10 = vector.multi_reduction <add>, %9, %cst_6 [1] : vector<8x32xf32> to vector<8xf32>
    %11 = vector.shape_cast %10 : vector<8xf32> to vector<8x1xf32>
    %12 = arith.addf %8, %11 : vector<8x1xf32>
    %c0_7 = arith.constant 0 : index
    %c0_8 = arith.constant 0 : index
    %13 = vector.load %arg6[%c0_7, %c0_8] : memref<8x1xf32, #tpu.memory_space<vmem>>, vector<8x1xf32>
    tpu.vector_store %arg6[%c0_7, %c0_8], %12 {strides = array<i32>} : memref<8x1xf32, #tpu.memory_space<vmem>>, vector<8x1xf32>,
    %c0_i32_9 = arith.constant 0 : i32
    %14 = arith.cmpi eq, %arg1, %c0_i32_9 : i32
    %15 = arith.extui %14 : i1 to i32
    %c0_i32_10 = arith.constant 0 : i32
    %16 = arith.cmpi ne, %15, %c0_i32_10 : i32
    scf.if %16 {
      %c0_11 = arith.constant 0 : index
      %c0_12 = arith.constant 0 : index
      %17 = vector.load %arg6[%c0_11, %c0_12] : memref<8x1xf32, #tpu.memory_space<vmem>>, vector<8x1xf32>
      %18 = math.sqrt %17 : vector<8x1xf32>
      %c0_13 = arith.constant 0 : index
      %c0_14 = arith.constant 0 : index
      %19 = vector.load %arg4[%c0_13, %c0_14] : memref<8x1xf32, #tpu.memory_space<vmem>>, vector<8x1xf32>
      %cst_15 = arith.constant 1.000000e+00 : f32
      %20 = vector.broadcast %cst_15 : f32 to vector<8x1xf32>
      %21 = arith.subf %20, %18 : vector<8x1xf32>
      %cst_16 = arith.constant 0.000000e+00 : f32
      %22 = vector.broadcast %cst_16 : f32 to vector<8x1xf32>
      %23 = arith.maximumf %21, %22 : vector<8x1xf32>
      %24 = arith.mulf %19, %17 : vector<8x1xf32>
      %cst_17 = arith.constant 1.000000e+00 : f32
      %25 = vector.broadcast %cst_17 : f32 to vector<8x1xf32>
      %26 = arith.subf %25, %19 : vector<8x1xf32>
      %27 = arith.mulf %23, %23 : vector<8x1xf32>
      %28 = arith.mulf %26, %27 : vector<8x1xf32>
      %29 = arith.addf %24, %28 : vector<8x1xf32>
      %c0_18 = arith.constant 0 : index
      %c0_19 = arith.constant 0 : index
      %30 = vector.load %arg5[%c0_18, %c0_19] : memref<8x1xf32, #tpu.memory_space<vmem>>, vector<8x1xf32>
      tpu.vector_store %arg5[%c0_18, %c0_19], %29 {strides = array<i32>} : memref<8x1xf32, #tpu.memory_space<vmem>>, vector<8x1xf32>,
    } else {
    }
    return
  }
  func.func @transform_0(%arg0: i32, %arg1: i32) -> (i32, i32) {
    %c0_i32 = arith.constant 0 : i32
    return %arg0, %arg1 : i32, i32
  }
  func.func @transform_1(%arg0: i32, %arg1: i32) -> (i32, i32) {
    %c0_i32 = arith.constant 0 : i32
    return %arg0, %arg1 : i32, i32
  }
  func.func @transform_2(%arg0: i32, %arg1: i32) -> (i32, i32) {
    %c0_i32 = arith.constant 0 : i32
    %c0_i32_0 = arith.constant 0 : i32
    return %arg0, %c0_i32 : i32, i32
  }
  func.func @transform_3(%arg0: i32, %arg1: i32) -> (i32, i32) {
    %c0_i32 = arith.constant 0 : i32
    %c0_i32_0 = arith.constant 0 : i32
    return %arg0, %c0_i32 : i32, i32
  }
}

</mosaic_0001>

<bundles_post_ra>
// kernel: tpu_custom_call.1
= control target key start
LH: loop header
LB: loop body
LE: loop exit
PB: predicated region body
PF: predicated region fallthrough
CT: control target
= control target key end

     0   :  { %8 = vsyncpa [#allocation4], 0  ;;  %s673_s0 = inlined_call_operand.vmem [shape: f32[16,32], index: 0, kind: input, shape index: {}]   ;;  %s674_s1 = inlined_call_operand.hbm [shape: f32[16,32], index: 1, kind: input, shape index: {}]   ;;  %s675_s2 = inlined_call_operand.vmem [shape: f32[16,1], index: 2, kind: input, shape index: {}]   ;;  %s676_s3 = inlined_call_operand.vmem [shape: f32[16,1], index: 3, kind: output, shape index: {}]  }
   0x1   :  { %10 = vsyncpa [#allocation4 + $0x1], 0  ;;  %s559_s12 = smov 0   ;;  %s561_s13 = smov 0  }
   0x2   :  { %s563_s14 = smov 0   ;;  %s565_s15 = smov 0  }
   0x3   :  { %s567_s16 = smov 0   ;;  %s569_s17 = smov 0  }
   0x4 LB: > { %s386_s18 = sadd.s32 4294967295, %s535_s17   ;;  %s28_s19 = sadd.s32 1, %s531_s16  ;;  %s535_s17 = sphi %s569_s17, %s16_s17   ;;  %s531_s16 = sphi %s567_s16, %s684_s16   ;;  %s527_s15 = sphi %s565_s15, %s683_s15   ;;  %s523_s14 = sphi %s563_s14, %s682_s14   ;;  %s519_s13 = sphi %s561_s13, %s681_s13   ;;  %s515_s12 = sphi %s559_s12, %s680_s12  }
   0x5   : > { %p30_p0 = scmp.ge.s32.totalorder %s28_s19, 2  ;;  %s65_s20 = sadd.s32 1, %s523_s14 }
   0x6   : > { %p72_p1 = scmp.ne.s32.totalorder %s523_s14, %s519_s13  ;;  %p73_p2 = scmp.eq.s32.totalorder %s535_s17, 0 }
   0x7   : > { %s686_s19 = smov (%p30_p0, %s28_s19), 0  ;;  %p78_p4 = scmp.ne.s32.totalorder %s519_s13, %s515_s12 }
   0x8   : > { %p595_p3 = por %p73_p2, %p72_p1  ;;  %s60_s22 = ssub.s32 %s531_s16, %s686_s19 }
   0x9   : > { %p79_p5 = scmp.eq.s32.totalorder %s386_s18, 0  ;;  %p63_p6 = scmp.eq.s32.totalorder %s60_s22, 0 }
   0xa   : > { %p405_p8 = scmp.lt.s32.totalorder %s535_s17, 2  ;;  %s164_s25 = sand.u32 1, %s523_s14  }
   0xb   : > { %p602_p7 = por %p79_p5, %p78_p4  ;;  %s391_s26 = sshll.u32 %s531_s16, 7 }
   0xc   : > { %s608_s24 = scalar_select %p63_p6, %s523_s14, %s65_s20  }
   0xd   : > { %s390_s27 = sshll.u32 %s164_s25, 3  ;;  %s174_s30 = scalar_lea.hbm %s674_s1, %s391_s26 }
   0xe   : > { %s168_s4 = scalar_lea.vmem [#allocation3], %s390_s27  ;;  %p617_p9 = pnand %p405_p8, %p595_p3 }
   0xf   : > { %s176_s5 = sshll.u32 %s168_s4, 4  ;;  %p392_p10 = scmp.ge.s32.totalorder %s535_s17, 1  ;;  %s177_s5 = int_to_ptr.vmem [resolvable:$true] %s176_s5 }
  0x10   : > { %p188_p11 = scmp.lt.s32.totalorder %s535_s17, 3  ;;  %s165_s7 = scalar_lea.sflag [#allocation4], %s164_s25 }
  0x11   : > { %p459_p12 = pneg %p617_p9  ;;  %s470_s8 = scalar_lea.vmem %s177_s5, 128 }
  0x12   : > { %p471_p13 = scmp.ne.s32.totalorder %s177_s5, %s470_s8  ;;  %s537_s9 = smov [#allocation3]  }
  0x13   : > { %s475_s10 = sshll.u32 %s537_s9, 4  ;;  %s476_s10 = int_to_ptr.vmem [resolvable:$false] %s475_s10 }
  0x14   : > { %p473_p0 = pnand %p471_p13, %p459_p12  ;;  %s477_s11 = scalar_lea.vmem %s476_s10, 256 }
  0x15   : > { %p478_p2 = scmp.lt.s32.totalorder %s177_s5, %s476_s10  ;;  %p479_p3 = scmp.lt.s32.totalorder %s477_s11, %s470_s8 }
  0x16   : > { %p474_p1 = pneg %p473_p0 }
  0x17   : > { %p480_p4 = por %p479_p3, %p478_p2 }
  0x19   : > { %p481_p5 = pnand %p480_p4, %p474_p1 }
  0x1b   : > { %484 = shalt.err (!%p481_p5)
}
  0x1c   : > { %404 = dma.hbm_to_vmem [thread:$0]  (!%p617_p9), %s174_s30, 128, %s177_s5, %s165_s7  }
  0x1d   : > { %p189_p6 = pnand %p392_p10, %p188_p11 }
  0x1e   : > { %s194_s12 = sand.u32 (!%p189_p6), 1, %s519_s13  }
  0x1f   : > { %192 = sbr.rel (%p189_p6) target bundleno = 227 (0xe3), region = 32  ;;  %s393_s18 = sshll.u32 (!%p189_p6), %s194_s12, 3 }
  0x20   : > { %s195_s20 = scalar_lea.sflag (!%p189_p6), [#allocation4], %s194_s12  ;;  %s198_s21 = scalar_lea.vmem (!%p189_p6), [#allocation3], %s393_s18 }
  0x24   : > { %510 = dma.done.wait (%p602_p7), %s195_s20, 128  }
  0x25   : > { %512 = vsyncadd (%p602_p7), %s195_s20, 4294967168  ;;  %p231_p8 = scmp.lt.s32.totalorder %s527_s15, 1  ;;  %vm250_vm0 = vcmask 7168   ;;  %v538_v0 = vmov 0.0   ;;  %v253_v2 = vld [vmem:[%s198_s21] sm:$0xff]  ;;  %vm258_vm1 = vcmask 261120  }
  0x26   : > { %251 = vst.msk [vmem:[#allocation2] sm:$0xff] %vm250_vm0, %v538_v0 }
  0x27   : > { %s688_s15 = smov (!%p231_p8, %s527_s15), 1 }
  0x28   : > { %s639_s22 = sshll.u32 %s688_s15, 3 }
  0x29   : > { %s237_s27 = scalar_lea.vmem %s673_s0, %s639_s22  ;;  %s241_s28 = scalar_lea.vmem %s675_s2, %s639_s22 }
  0x2a   : > { %v252_v1 = vld [vmem:[%s237_s27] sm:$0xff]  ;;  %s245_s4 = scalar_lea.vmem %s676_s3, %s639_s22 }
  0x2b   : > { %v254_v3 = vsub.f32 %v252_v1, %v253_v2  ;;  %v276_v17 = vld [vmem:[%s241_s28] sm:$0xff] }
  0x2c   : > { %v280_v18 = vsub.f32 1.0, %v276_v17 }
  0x2d   : > { %v255_v4 = vadd.f32 1e-09, %v254_v3  ;;  %v256_v7 = vld [vmem:[#allocation2] sm:$0xff] }
  0x2f   : > { %v257_v5 = vmul.f32 %v255_v4, %v255_v4 }
  0x31   : > { %v259_v6 = vsel %vm258_vm1, %v257_v5, 0.0 }
  0x32   : > { %260 = vadd.xlane.f32.xlu0 %v259_v6 }
  0xbb   : > { %v261_v8 = vpop.xlane.xlu0 %260 }
  0xbc   : > { %v262_v9 = vadd.f32 %v261_v8, %v256_v7 }
  0xbe   : > { %264 = vst.msk [vmem:[#allocation2] sm:$0xff] %vm250_vm0, %v262_v9 }
  0xc5   : > { %v268_v10 = vld [vmem:[#allocation2] sm:$0xff] }
  0xc6   : > { %455 = vrsqrt.f32 %v268_v10  ;;  %vm271_vm2 = vcmp.eq.f32.partialorder %v268_v10, inf  ;;  %v274_v13 = vand.u32 2147483648, %v268_v10  ;;  %vm273_vm3 = vcmp.eq.f32.partialorder %v268_v10, 0.0 }
  0xc7   : > { %v279_v21 = vmul.f32 %v276_v17, %v268_v10 }
  0xd3   : > { %v456_v11 = vpop.eup %455 }
  0xd4   : > { %v270_v12 = vmul.f32 %v456_v11, %v268_v10 }
  0xd6   : > { %v272_v14 = vsel %vm271_vm2, %v268_v10, %v270_v12 }
  0xd7   : > { %v275_v15 = vsel %vm273_vm3, %v274_v13, %v272_v14 }
  0xd8   : > { %v277_v16 = vsub.f32 1.0, %v275_v15 }
  0xda   : > { %v278_v19 = vmax.f32 %v277_v16, 0.0 }
  0xdc   : > { %v281_v20 = vmul.f32 %v278_v19, %v278_v19 }
  0xde   : > { %v282_v22 = vmul.f32 %v281_v20, %v280_v18 }
  0xe0   : > { %v283_v23 = vadd.f32 %v282_v22, %v279_v21 }
  0xe2   : > { %284 = vst.msk [vmem:[%s245_s4] sm:$0xff] %vm250_vm0, %v283_v23 }
  0xe3 PF: > { %s16_s17 = sadd.s32 1, %s535_s17   ;;  %s680_s12 = smov %s519_s13 }
  0xe4   : > { %p13_p7 = scmp.ge.s32.totalorder %s16_s17, 4   ;;  %s681_s13 = smov %s523_s14 }
  0xe5   : > { %s682_s14 = smov %s608_s24  ;;  %s683_s15 = smov %s531_s16 }
  0xe6   : > { %s684_s16 = smov %s686_s19  ;;  %15 = sbr.rel (!%p13_p7) target bundleno = 4 (0x4), region = 86 }
  0xeb   :  { %304 = vsyncpa [#allocation4], 1 }
  0xec   :  { %306 = vsyncpa [#allocation4 + $0x1], 1 }

</bundles_post_ra>
